<compile_context>
chip_gen: v5e
topology: v5e:2x2
jax: 0.10.0
libtpu: 0.0.40
codegen_flags: <defaults>
</compile_context>

<pallas_src>
import functools
import math

import jax
import jax.numpy as jnp
from jax import lax
from jax.experimental import pallas as pl
from jax.experimental.pallas import tpu as pltpu


def _pick_tile(n, target, align):
    """Largest divisor of n that is <= target and align-multiple (else full axis)."""
    t = min(n, target)
    while t > 1:
        if n % t == 0 and (t % align == 0 or t == n):
            return t
        t -= 1
    return n


# ---------------------------------------------------------------------------
# Row/column-tiled Linear:  y = x @ W^T + b
# Grid = (col_tiles, row_tiles): weight/bias column block resident across rows.
# ---------------------------------------------------------------------------
def _linear_kernel(x_ref, wt_ref, b_ref, o_ref):
    acc = jnp.dot(x_ref[...], wt_ref[...], preferred_element_type=jnp.float32)
    o_ref[...] = (acc + b_ref[...].astype(jnp.float32)).astype(o_ref.dtype)


def _linear(x2d, wt, b_row, *, tile_rows=256, tile_cols=512):
    n, d_in = x2d.shape
    d_out = wt.shape[1]
    tn = _pick_tile(n, tile_rows, 8)
    tc = _pick_tile(d_out, tile_cols, 128)
    return pl.pallas_call(
        _linear_kernel,
        out_shape=jax.ShapeDtypeStruct((n, d_out), x2d.dtype),
        grid_spec=pltpu.PrefetchScalarGridSpec(
            num_scalar_prefetch=0,
            grid=(d_out // tc, n // tn),
            in_specs=[
                pl.BlockSpec((tn, d_in), lambda j, i: (i, 0)),   # pipelined x rows
                pl.BlockSpec((d_in, tc), lambda j, i: (0, j)),   # resident W^T cols
                pl.BlockSpec((1, tc), lambda j, i: (0, j)),      # resident bias cols
            ],
            out_specs=pl.BlockSpec((tn, tc), lambda j, i: (i, j)),
        ),
        compiler_params=pltpu.CompilerParams(
            dimension_semantics=("parallel", "parallel")),
    )(x2d, wt, b_row)


# ---------------------------------------------------------------------------
# Fused Q/K/V projection: one pallas_call, three pipelined inputs, three
# (N, d_model) outputs (no jnp.stack, no head-split transpose afterwards).
# ---------------------------------------------------------------------------
def _qkv_kernel(xq_ref, xk_ref, xv_ref, wq_ref, wk_ref, wv_ref,
                bq_ref, bk_ref, bv_ref, q_ref, k_ref, v_ref):
    for x_ref, w_ref, b_ref, o_ref in ((xq_ref, wq_ref, bq_ref, q_ref),
                                       (xk_ref, wk_ref, bk_ref, k_ref),
                                       (xv_ref, wv_ref, bv_ref, v_ref)):
        acc = jnp.dot(x_ref[...], w_ref[...], preferred_element_type=jnp.float32)
        o_ref[...] = (acc + b_ref[...].astype(jnp.float32)).astype(o_ref.dtype)


def _qkv_project(xq, xk, xv, wqT, wkT, wvT, bq, bk, bv,
                 *, tile_rows=256, tile_cols=512):
    n, d_in = xq.shape
    d_out = wqT.shape[1]
    tn = _pick_tile(n, tile_rows, 8)
    tc = _pick_tile(d_out, tile_cols, 128)
    x_spec = pl.BlockSpec((tn, d_in), lambda j, i: (i, 0))
    w_spec = pl.BlockSpec((d_in, tc), lambda j, i: (0, j))
    b_spec = pl.BlockSpec((1, tc), lambda j, i: (0, j))
    o_spec = pl.BlockSpec((tn, tc), lambda j, i: (i, j))
    out_sd = jax.ShapeDtypeStruct((n, d_out), xq.dtype)
    return pl.pallas_call(
        _qkv_kernel,
        out_shape=(out_sd, out_sd, out_sd),
        grid_spec=pltpu.PrefetchScalarGridSpec(
            num_scalar_prefetch=0,
            grid=(d_out // tc, n // tn),
            in_specs=[x_spec, x_spec, x_spec,
                      w_spec, w_spec, w_spec,
                      b_spec, b_spec, b_spec],
            out_specs=(o_spec, o_spec, o_spec),
        ),
        compiler_params=pltpu.CompilerParams(
            dimension_semantics=("parallel", "parallel")),
    )(xq, xk, xv, wqT, wkT, wvT, bq, bk, bv)


# ---------------------------------------------------------------------------
# Flash-attention (online softmax).  Scale is pre-folded into the Q projection.
# ---------------------------------------------------------------------------
def _flash_attn_kernel(q_ref, k_ref, v_ref, o_ref, m_sc, l_sc, acc_sc, *, kv_axis):
    kv = pl.program_id(kv_axis)

    @pl.when(kv == 0)
    def _init():
        m_sc[...] = jnp.full(m_sc.shape, -jnp.inf, m_sc.dtype)
        l_sc[...] = jnp.zeros(l_sc.shape, l_sc.dtype)
        acc_sc[...] = jnp.zeros(acc_sc.shape, acc_sc.dtype)

    q = q_ref[...]                                    # (tq, d_k) input dtype
    k = k_ref[...]                                    # (tk, d_k)
    v = v_ref[...]                                    # (tk, d_k)

    # scores: contract on d_k directly (no k.T materialization)
    s = lax.dot_general(q, k, dimension_numbers=(((1,), (1,)), ((), ())),
                        preferred_element_type=jnp.float32)       # (tq, tk) f32

    m_prev = m_sc[...]                                # (tq, 1) f32
    m_new = jnp.maximum(m_prev, s.max(axis=-1, keepdims=True))
    alpha = jnp.exp(m_prev - m_new)
    p = jnp.exp(s - m_new)                            # (tq, tk) f32

    l_sc[...] = alpha * l_sc[...] + p.sum(axis=-1, keepdims=True)
    acc_sc[...] = alpha * acc_sc[...] + jnp.dot(
        p.astype(v.dtype), v, preferred_element_type=jnp.float32)
    m_sc[...] = m_new

    @pl.when(kv == pl.num_programs(kv_axis) - 1)
    def _finalize():
        inv_l = pl.reciprocal(l_sc[...], approx=True)
        o_ref[...] = (acc_sc[...] * inv_l).astype(o_ref.dtype)


def _attn_tiles(S, d_k, itemsize, tile_q, tile_k):
    tq = _pick_tile(S, tile_q, 8)
    # If K+V for the full sequence (double-buffered) is cheap, keep them
    # VMEM-resident across all q tiles (kills the K/V re-fetch; v5e/v6e win).
    kv_bytes = 2 * 2 * S * d_k * itemsize
    tk = S if kv_bytes <= (8 << 20) else _pick_tile(S, tile_k, 8)
    return tq, tk


def _flash_attention_headcols(q2d, k2d, v2d, *, B, S, h, d_k, tile_q, tile_k):
    """Fast path: arrays stay in (B*S, d_model) layout; heads picked via column blocks."""
    N, d_model = q2d.shape
    tq, tk = _attn_tiles(S, d_k, q2d.dtype.itemsize, tile_q, tile_k)
    nq, nk = S // tq, S // tk
    q_spec = pl.BlockSpec((tq, d_k), lambda b, hh, qi, ki: (b * nq + qi, hh))
    kv_spec = pl.BlockSpec((tk, d_k), lambda b, hh, qi, ki: (b * nk + ki, hh))
    o_spec = pl.BlockSpec((tq, d_k), lambda b, hh, qi, ki: (b * nq + qi, hh))
    return pl.pallas_call(
        functools.partial(_flash_attn_kernel, kv_axis=3),
        out_shape=jax.ShapeDtypeStruct((N, d_model), q2d.dtype),
        grid_spec=pltpu.PrefetchScalarGridSpec(
            num_scalar_prefetch=0,
            grid=(B, h, nq, nk),
            in_specs=[q_spec, kv_spec, kv_spec],
            out_specs=o_spec,
            scratch_shapes=[
                pltpu.VMEM((tq, 1), jnp.float32),     # running max m
                pltpu.VMEM((tq, 1), jnp.float32),     # running denom l
                pltpu.VMEM((tq, d_k), jnp.float32),   # accumulator
            ],
        ),
        compiler_params=pltpu.CompilerParams(
            dimension_semantics=("parallel", "parallel", "parallel", "arbitrary")),
    )(q2d, k2d, v2d)


def _flash_attention_split(qh, kh, vh, *, tile_q, tile_k):
    """Fallback for head dims that are not lane-dense: (B*h, S, d_k) layout."""
    BH, S, d_k = qh.shape
    tq, tk = _attn_tiles(S, d_k, qh.dtype.itemsize, tile_q, tile_k)
    nq, nk = S // tq, S // tk
    return pl.pallas_call(
        functools.partial(_flash_attn_kernel, kv_axis=2),
        out_shape=jax.ShapeDtypeStruct((BH, S, d_k), qh.dtype),
        grid_spec=pltpu.PrefetchScalarGridSpec(
            num_scalar_prefetch=0,
            grid=(BH, nq, nk),
            in_specs=[
                pl.BlockSpec((None, tq, d_k), lambda bh, qi, ki: (bh, qi, 0)),
                pl.BlockSpec((None, tk, d_k), lambda bh, qi, ki: (bh, ki, 0)),
                pl.BlockSpec((None, tk, d_k), lambda bh, qi, ki: (bh, ki, 0)),
            ],
            out_specs=pl.BlockSpec((None, tq, d_k), lambda bh, qi, ki: (bh, qi, 0)),
            scratch_shapes=[
                pltpu.VMEM((tq, 1), jnp.float32),
                pltpu.VMEM((tq, 1), jnp.float32),
                pltpu.VMEM((tq, d_k), jnp.float32),
            ],
        ),
        compiler_params=pltpu.CompilerParams(
            dimension_semantics=("parallel", "parallel", "arbitrary")),
    )(qh, kh, vh)


# ---------------------------------------------------------------------------
# Parameter preparation (one-time: transpose weights, fold 1/sqrt(d_k) into Wq)
# ---------------------------------------------------------------------------
def prepare_params(params, *, h, dtype=None):
    d_model = params["wq"].shape[0]
    assert d_model % h == 0
    d_k = d_model // h
    inv = 1.0 / math.sqrt(d_k)

    def cast(a):
        return a if dtype is None else a.astype(dtype)

    return {
        "wqT": cast((params["wq"] * inv).T),
        "wkT": cast(params["wk"].T),
        "wvT": cast(params["wv"].T),
        "woT": cast(params["wo"].T),
        "bq": cast(params["bq"] * inv)[None, :],
        "bk": cast(params["bk"])[None, :],
        "bv": cast(params["bv"])[None, :],
        "bo": cast(params["bo"])[None, :],
    }


# ---------------------------------------------------------------------------
# Full module forward
# ---------------------------------------------------------------------------
def multi_headed_attention(query, key, value, params, *, h,
                           tile_rows=256, tile_cols=512, tile_q=512, tile_k=512):
    """query/key/value: (B, S, d_model) -> (B, S, d_model)."""
    prep = params if "wqT" in params else prepare_params(params, h=h)

    B, S, d_model = query.shape
    assert d_model % h == 0
    d_k = d_model // h
    n = B * S

    in_dtype = query.dtype
    w_dtype = prep["wqT"].dtype
    if in_dtype != w_dtype:   # e.g. bf16-prepared params -> bf16 MXU path
        query = query.astype(w_dtype)
        key = key.astype(w_dtype)
        value = value.astype(w_dtype)

    xq = query.reshape(n, d_model)
    xk = key.reshape(n, d_model)
    xv = value.reshape(n, d_model)

    # --- Q/K/V projections (single fused pallas_call, no stacking) ----------
    q2d, k2d, v2d = _qkv_project(xq, xk, xv,
                                 prep["wqT"], prep["wkT"], prep["wvT"],
                                 prep["bq"], prep["bk"], prep["bv"],
                                 tile_rows=tile_rows, tile_cols=tile_cols)

    # --- scaled-dot-product attention (flash, online softmax) ----------------
    if d_k % 128 == 0 and S % 8 == 0:
        # Fast path: heads addressed via BlockSpec column blocks; no transposes.
        ctx2d = _flash_attention_headcols(q2d, k2d, v2d, B=B, S=S, h=h, d_k=d_k,
                                          tile_q=tile_q, tile_k=tile_k)
    else:
        # Fallback for non-lane-dense head dims: explicit head split/merge.
        def to_heads(t):
            return (t.reshape(B, S, h, d_k)
                     .transpose(0, 2, 1, 3)
                     .reshape(B * h, S, d_k))

        ctx = _flash_attention_split(to_heads(q2d), to_heads(k2d), to_heads(v2d),
                                     tile_q=tile_q, tile_k=tile_k)
        ctx2d = (ctx.reshape(B, h, S, d_k)
                    .transpose(0, 2, 1, 3)
                    .reshape(n, d_model))

    # --- output projection ----------------------------------------------------
    out2d = _linear(ctx2d, prep["woT"], prep["bo"],
                    tile_rows=tile_rows, tile_cols=tile_cols)
    out = out2d.reshape(B, S, d_model)
    return out if out.dtype == in_dtype else out.astype(in_dtype)


# ---------------------------------------------------------------------------
# Parameters + pure-JAX reference
# ---------------------------------------------------------------------------
def init_params(key, d_model):
    ks = jax.random.split(key, 8)
    bound = 1.0 / math.sqrt(d_model)

    def w(k):
        return jax.random.uniform(k, (d_model, d_model), jnp.float32, -bound, bound)

    def b(k):
        return jax.random.uniform(k, (d_model,), jnp.float32, -bound, bound)

    return {
        "wq": w(ks[0]), "bq": b(ks[1]),
        "wk": w(ks[2]), "bk": b(ks[3]),
        "wv": w(ks[4]), "bv": b(ks[5]),
        "wo": w(ks[6]), "bo": b(ks[7]),
    }


def _reference(query, key, value, params, *, h):
    B, S, d_model = query.shape
    d_k = d_model // h

    def lin(x, w, bias):
        return x @ w.T + bias

    def heads(t):
        return t.reshape(B, S, h, d_k).transpose(0, 2, 1, 3)

    q = heads(lin(query, params["wq"], params["bq"]))
    k = heads(lin(key, params["wk"], params["bk"]))
    v = heads(lin(value, params["wv"], params["bv"]))
    scores = jnp.einsum("bhqd,bhkd->bhqk", q, k) / math.sqrt(d_k)
    p = jax.nn.softmax(scores, axis=-1)
    ctx = jnp.einsum("bhqk,bhkd->bhqd", p, v)
    ctx = ctx.transpose(0, 2, 1, 3).reshape(B, S, d_model)
    return lin(ctx, params["wo"], params["bo"])


if __name__ == "__main__":
    root = jax.random.PRNGKey(0)

    # --- main check: lane-dense head dim -> fast (transpose-free) path -------
    B, S, d_model, h = 2, 16, 256, 2          # d_k = 128
    kq, kk, kv, kp = jax.random.split(root, 4)
    query = jax.random.normal(kq, (B, S, d_model), jnp.float32)
    key_t = jax.random.normal(kk, (B, S, d_model), jnp.float32)
    value = jax.random.normal(kv, (B, S, d_model), jnp.float32)
    params = init_params(kp, d_model)
    prep = prepare_params(params, h=h)        # one-time transpose / scale fold

    out = multi_headed_attention(query, key_t, value, prep, h=h)
    out = jax.block_until_ready(out)
    ref = _reference(query, key_t, value, params, h=h)
    assert out.shape == (B, S, d_model)
    err = float(jnp.max(jnp.abs(out - ref)))
    assert jnp.allclose(out, ref, atol=2e-2, rtol=2e-2), err

    # --- secondary check: small head dim -> fallback (head-split) path -------
    B2, S2, d2, h2 = 2, 8, 32, 4              # d_k = 8
    kq2, kk2, kv2, kp2 = jax.random.split(jax.random.PRNGKey(1), 4)
    q2 = jax.random.normal(kq2, (B2, S2, d2), jnp.float32)
    k2 = jax.random.normal(kk2, (B2, S2, d2), jnp.float32)
    v2 = jax.random.normal(kv2, (B2, S2, d2), jnp.float32)
    p2 = init_params(kp2, d2)
    out2 = jax.block_until_ready(multi_headed_attention(q2, k2, v2, p2, h=h2))
    ref2 = _reference(q2, k2, v2, p2, h=h2)
    err2 = float(jnp.max(jnp.abs(out2 - ref2)))
    assert jnp.allclose(out2, ref2, atol=2e-2, rtol=2e-2), err2

    print("KERNEL_OK")
</pallas_src>

<mosaic_0001>
module attributes {stable_mosaic.version = 11 : i64} {
  func.func @_qkv_kernel(%arg0: i32, %arg1: i32, %arg2: memref<32x256xf32, #tpu.memory_space<vmem>>, %arg3: memref<32x256xf32, #tpu.memory_space<vmem>>, %arg4: memref<32x256xf32, #tpu.memory_space<vmem>>, %arg5: memref<256x256xf32, #tpu.memory_space<vmem>>, %arg6: memref<256x256xf32, #tpu.memory_space<vmem>>, %arg7: memref<256x256xf32, #tpu.memory_space<vmem>>, %arg8: memref<1x256xf32, #tpu.memory_space<vmem>>, %arg9: memref<1x256xf32, #tpu.memory_space<vmem>>, %arg10: memref<1x256xf32, #tpu.memory_space<vmem>>, %arg11: memref<32x256xf32, #tpu.memory_space<vmem>>, %arg12: memref<32x256xf32, #tpu.memory_space<vmem>>, %arg13: memref<32x256xf32, #tpu.memory_space<vmem>>) attributes {dimension_semantics = [#tpu.dimension_semantics<parallel>, #tpu.dimension_semantics<parallel>], iteration_bounds = array<i64: 1, 1>, scalar_prefetch = 0 : i64, scratch_operands = 0 : i64, tpu.core_type = #tpu.core_type<tc>, window_params = [{transform_indices = @transform_0, window_bounds = array<i64: 32, 256>}, {transform_indices = @transform_1, window_bounds = array<i64: 32, 256>}, {transform_indices = @transform_2, window_bounds = array<i64: 32, 256>}, {transform_indices = @transform_3, window_bounds = array<i64: 256, 256>}, {transform_indices = @transform_4, window_bounds = array<i64: 256, 256>}, {transform_indices = @transform_5, window_bounds = array<i64: 256, 256>}, {transform_indices = @transform_6, window_bounds = array<i64: 1, 256>}, {transform_indices = @transform_7, window_bounds = array<i64: 1, 256>}, {transform_indices = @transform_8, window_bounds = array<i64: 1, 256>}, {transform_indices = @transform_9, window_bounds = array<i64: 32, 256>}, {transform_indices = @transform_10, window_bounds = array<i64: 32, 256>}, {transform_indices = @transform_11, window_bounds = array<i64: 32, 256>}]} {
    %c0 = arith.constant 0 : index
    %c0_0 = arith.constant 0 : index
    %0 = vector.load %arg2[%c0, %c0_0] : memref<32x256xf32, #tpu.memory_space<vmem>>, vector<32x256xf32>
    %c0_1 = arith.constant 0 : index
    %c0_2 = arith.constant 0 : index
    %1 = vector.load %arg5[%c0_1, %c0_2] : memref<256x256xf32, #tpu.memory_space<vmem>>, vector<256x256xf32>
    %cst = arith.constant dense<0.000000e+00> : vector<32x256xf32>
    %2 = tpu.matmul %0, %1, %cst {dimension_numbers = #tpu.dot_dimension_numbers<[1], [0], [0], [1], [0, 0, 1, 1], [], []>} : vector<32x256xf32>, vector<256x256xf32>, vector<32x256xf32> -> vector<32x256xf32>
    %c0_3 = arith.constant 0 : index
    %c0_4 = arith.constant 0 : index
    %3 = vector.load %arg8[%c0_3, %c0_4] : memref<1x256xf32, #tpu.memory_space<vmem>>, vector<1x256xf32>
    %4 = vector.broadcast %3 : vector<1x256xf32> to vector<32x256xf32>
    %5 = arith.addf %2, %4 : vector<32x256xf32>
    %c0_5 = arith.constant 0 : index
    %c0_6 = arith.constant 0 : index
    %6 = vector.load %arg11[%c0_5, %c0_6] : memref<32x256xf32, #tpu.memory_space<vmem>>, vector<32x256xf32>
    tpu.vector_store %arg11[%c0_5, %c0_6], %5 {strides = array<i32>} : memref<32x256xf32, #tpu.memory_space<vmem>>, vector<32x256xf32>,
    %c0_7 = arith.constant 0 : index
    %c0_8 = arith.constant 0 : index
    %7 = vector.load %arg3[%c0_7, %c0_8] : memref<32x256xf32, #tpu.memory_space<vmem>>, vector<32x256xf32>
    %c0_9 = arith.constant 0 : index
    %c0_10 = arith.constant 0 : index
    %8 = vector.load %arg6[%c0_9, %c0_10] : memref<256x256xf32, #tpu.memory_space<vmem>>, vector<256x256xf32>
    %cst_11 = arith.constant dense<0.000000e+00> : vector<32x256xf32>
    %9 = tpu.matmul %7, %8, %cst_11 {dimension_numbers = #tpu.dot_dimension_numbers<[1], [0], [0], [1], [0, 0, 1, 1], [], []>} : vector<32x256xf32>, vector<256x256xf32>, vector<32x256xf32> -> vector<32x256xf32>
    %c0_12 = arith.constant 0 : index
    %c0_13 = arith.constant 0 : index
    %10 = vector.load %arg9[%c0_12, %c0_13] : memref<1x256xf32, #tpu.memory_space<vmem>>, vector<1x256xf32>
    %11 = vector.broadcast %10 : vector<1x256xf32> to vector<32x256xf32>
    %12 = arith.addf %9, %11 : vector<32x256xf32>
    %c0_14 = arith.constant 0 : index
    %c0_15 = arith.constant 0 : index
    %13 = vector.load %arg12[%c0_14, %c0_15] : memref<32x256xf32, #tpu.memory_space<vmem>>, vector<32x256xf32>
    tpu.vector_store %arg12[%c0_14, %c0_15], %12 {strides = array<i32>} : memref<32x256xf32, #tpu.memory_space<vmem>>, vector<32x256xf32>,
    %c0_16 = arith.constant 0 : index
    %c0_17 = arith.constant 0 : index
    %14 = vector.load %arg4[%c0_16, %c0_17] : memref<32x256xf32, #tpu.memory_space<vmem>>, vector<32x256xf32>
    %c0_18 = arith.constant 0 : index
    %c0_19 = arith.constant 0 : index
    %15 = vector.load %arg7[%c0_18, %c0_19] : memref<256x256xf32, #tpu.memory_space<vmem>>, vector<256x256xf32>
    %cst_20 = arith.constant dense<0.000000e+00> : vector<32x256xf32>
    %16 = tpu.matmul %14, %15, %cst_20 {dimension_numbers = #tpu.dot_dimension_numbers<[1], [0], [0], [1], [0, 0, 1, 1], [], []>} : vector<32x256xf32>, vector<256x256xf32>, vector<32x256xf32> -> vector<32x256xf32>
    %c0_21 = arith.constant 0 : index
    %c0_22 = arith.constant 0 : index
    %17 = vector.load %arg10[%c0_21, %c0_22] : memref<1x256xf32, #tpu.memory_space<vmem>>, vector<1x256xf32>
    %18 = vector.broadcast %17 : vector<1x256xf32> to vector<32x256xf32>
    %19 = arith.addf %16, %18 : vector<32x256xf32>
    %c0_23 = arith.constant 0 : index
    %c0_24 = arith.constant 0 : index
    %20 = vector.load %arg13[%c0_23, %c0_24] : memref<32x256xf32, #tpu.memory_space<vmem>>, vector<32x256xf32>
    tpu.vector_store %arg13[%c0_23, %c0_24], %19 {strides = array<i32>} : memref<32x256xf32, #tpu.memory_space<vmem>>, vector<32x256xf32>,
    return
  }
  func.func @transform_0(%arg0: i32, %arg1: i32) -> (i32, i32) {
    %c0_i32 = arith.constant 0 : i32
    %c0_i32_0 = arith.constant 0 : i32
    return %arg1, %c0_i32 : i32, i32
  }
  func.func @transform_1(%arg0: i32, %arg1: i32) -> (i32, i32) {
    %c0_i32 = arith.constant 0 : i32
    %c0_i32_0 = arith.constant 0 : i32
    return %arg1, %c0_i32 : i32, i32
  }
  func.func @transform_2(%arg0: i32, %arg1: i32) -> (i32, i32) {
    %c0_i32 = arith.constant 0 : i32
    %c0_i32_0 = arith.constant 0 : i32
    return %arg1, %c0_i32 : i32, i32
  }
  func.func @transform_3(%arg0: i32, %arg1: i32) -> (i32, i32) {
    %c0_i32 = arith.constant 0 : i32
    %c0_i32_0 = arith.constant 0 : i32
    return %c0_i32, %arg0 : i32, i32
  }
  func.func @transform_4(%arg0: i32, %arg1: i32) -> (i32, i32) {
    %c0_i32 = arith.constant 0 : i32
    %c0_i32_0 = arith.constant 0 : i32
    return %c0_i32, %arg0 : i32, i32
  }
  func.func @transform_5(%arg0: i32, %arg1: i32) -> (i32, i32) {
    %c0_i32 = arith.constant 0 : i32
    %c0_i32_0 = arith.constant 0 : i32
    return %c0_i32, %arg0 : i32, i32
  }
  func.func @transform_6(%arg0: i32, %arg1: i32) -> (i32, i32) {
    %c0_i32 = arith.constant 0 : i32
    %c0_i32_0 = arith.constant 0 : i32
    return %c0_i32, %arg0 : i32, i32
  }
  func.func @transform_7(%arg0: i32, %arg1: i32) -> (i32, i32) {
    %c0_i32 = arith.constant 0 : i32
    %c0_i32_0 = arith.constant 0 : i32
    return %c0_i32, %arg0 : i32, i32
  }
  func.func @transform_8(%arg0: i32, %arg1: i32) -> (i32, i32) {
    %c0_i32 = arith.constant 0 : i32
    %c0_i32_0 = arith.constant 0 : i32
    return %c0_i32, %arg0 : i32, i32
  }
  func.func @transform_9(%arg0: i32, %arg1: i32) -> (i32, i32) {
    %c0_i32 = arith.constant 0 : i32
    return %arg1, %arg0 : i32, i32
  }
  func.func @transform_10(%arg0: i32, %arg1: i32) -> (i32, i32) {
    %c0_i32 = arith.constant 0 : i32
    return %arg1, %arg0 : i32, i32
  }
  func.func @transform_11(%arg0: i32, %arg1: i32) -> (i32, i32) {
    %c0_i32 = arith.constant 0 : i32
    return %arg1, %arg0 : i32, i32
  }
}

</mosaic_0001>

<bundles_post_ra>
// kernel: tpu_custom_call.1
= control target key start
LH: loop header
LB: loop body
LE: loop exit
PB: predicated region body
PF: predicated region fallthrough
CT: control target
= control target key end

     0   :  { %17 = vsyncpa [#allocation3], 0  ;;  %s1167_s0 = inlined_call_operand.hbm [shape: f32[32,256], index: 0, kind: input, shape index: {}]   ;;  %s1168_s1 = inlined_call_operand.hbm [shape: f32[32,256], index: 1, kind: input, shape index: {}]   ;;  %s1169_s2 = inlined_call_operand.hbm [shape: f32[32,256], index: 2, kind: input, shape index: {}]   ;;  %s1170_s3 = inlined_call_operand.hbm [shape: f32[256,256], index: 3, kind: input, shape index: {}]   ;;  %s1171_s4 = inlined_call_operand.hbm [shape: f32[256,256], index: 4, kind: input, shape index: {}]   ;;  %s1172_s5 = inlined_call_operand.hbm [shape: f32[256,256], index: 5, kind: input, shape index: {}]   ;;  %s1173_s6 = inlined_call_operand.vmem [shape: f32[1,256], index: 6, kind: input, shape index: {}]   ;;  %s1174_s7 = inlined_call_operand.vmem [shape: f32[1,256], index: 7, kind: input, shape index: {}]   ;;  %s1175_s8 = inlined_call_operand.vmem [shape: f32[1,256], index: 8, kind: input, shape index: {}]   ;;  %s1176_s9 = inlined_call_operand.hbm [shape: f32[32,256], index: 9, kind: output, shape index: {0}]   ;;  %s1177_s10 = inlined_call_operand.hbm [shape: f32[32,256], index: 10, kind: output, shape index: {1}]   ;;  %s1178_s11 = inlined_call_operand.hbm [shape: f32[32,256], index: 11, kind: output, shape index: {2}]  }
   0x1   :  { %18 = vsyncpa [#allocation6], 0 }
   0x2   :  { %19 = vsyncpa [#allocation9], 0 }
   0x3   :  { %20 = vsyncpa [#allocation12], 0 }
   0x4   :  { %21 = vsyncpa [#allocation4], 0 }
   0x5   :  { %22 = vsyncpa [#allocation15], 0  ;;  %s40_s19 = sshll.u32 %s1168_s1, 4  ;;  %s1033_s20 = smov [#allocation5]   ;;  %s41_s19 = int_to_ptr.hbm [resolvable:$true] %s40_s19 }
   0x6   :  { %s42_s21 = sshll.u32 %s1033_s20, 4  ;;  %s66_s24 = sshll.u32 %s1170_s3, 4  ;;  %s43_s21 = int_to_ptr.vmem [resolvable:$true] %s42_s21  ;;  %s67_s24 = int_to_ptr.hbm [resolvable:$true] %s66_s24 }
   0x7   :  { %s1034_s25 = smov 256   ;;  %s1035_s26 = smov 16  }
   0x8   :  { %48 = dma.hbm_to_vmem [thread:$0]  %s41_s19, 1024, %s43_s21, [#allocation6], %s1034_s25, %s1034_s25, %s1035_s26  }
   0x9   :  { %s1036_s27 = smov [#allocation8]   ;;  %s27_s1 = sshll.u32 %s1167_s0, 4  ;;  %s28_s1 = int_to_ptr.hbm [resolvable:$true] %s27_s1 }
   0xa   :  { %s68_s28 = sshll.u32 %s1036_s27, 4  ;;  %s53_s13 = sshll.u32 %s1169_s2, 4  ;;  %s69_s28 = int_to_ptr.vmem [resolvable:$true] %s68_s28  ;;  %s54_s13 = int_to_ptr.hbm [resolvable:$true] %s53_s13 }
   0xb   :  { %74 = dma.hbm_to_vmem [thread:$0]  %s67_s24, 8192, %s69_s28, [#allocation9], %s1034_s25, %s1034_s25, %s1035_s26  }
   0xc   :  { %s1037_s14 = smov [#allocation2]   ;;  %s1038_s16 = smov [#allocation7]  }
   0xd   :  { %s29_s15 = sshll.u32 %s1037_s14, 4  ;;  %s55_s0 = sshll.u32 %s1038_s16, 4  ;;  %s30_s15 = int_to_ptr.vmem [resolvable:$true] %s29_s15  ;;  %s56_s0 = int_to_ptr.vmem [resolvable:$true] %s55_s0 }
   0xe   :  { %35 = dma.hbm_to_vmem [thread:$0]  %s28_s1, 1024, %s30_s15, [#allocation3], %s1034_s25, %s1034_s25, %s1035_s26  }
   0xf   :  { %s79_s19 = sshll.u32 %s1171_s4, 4  ;;  %s92_s21 = sshll.u32 %s1172_s5, 4  ;;  %s80_s19 = int_to_ptr.hbm [resolvable:$true] %s79_s19  ;;  %s93_s21 = int_to_ptr.hbm [resolvable:$true] %s92_s21 }
  0x10   :  { %61 = dma.hbm_to_vmem [thread:$0]  %s54_s13, 1024, %s56_s0, [#allocation6], %s1034_s25, %s1034_s25, %s1035_s26  }
  0x11   :  { %s1039_s22 = smov [#allocation10]   ;;  %s1040_s24 = smov [#allocation11]  }
  0x12   :  { %s81_s23 = sshll.u32 %s1039_s22, 4  ;;  %s94_s4 = sshll.u32 %s1040_s24, 4  ;;  %s82_s23 = int_to_ptr.vmem [resolvable:$true] %s81_s23  ;;  %s95_s4 = int_to_ptr.vmem [resolvable:$true] %s94_s4 }
  0x13   :  { %87 = dma.hbm_to_vmem [thread:$0]  %s80_s19, 8192, %s82_s23, [#allocation9], %s1034_s25, %s1034_s25, %s1035_s26  }
  0x14   :  { %100 = dma.hbm_to_vmem [thread:$0]  %s93_s21, 8192, %s95_s4, [#allocation12], %s1034_s25, %s1034_s25, %s1035_s26  }
  0x15   :  { %1021 = dma.done.wait [#allocation3], 1024  }
  0x16   :  { %1022 = vsyncadd [#allocation3], 4294966272 }
  0x17   :  { %1023 = dma.done.wait [#allocation6], 2048  }
  0x18   :  { %1024 = vsyncadd [#allocation6], 4294965248 }
  0x19   :  { %1025 = dma.done.wait [#allocation9], 16384  }
  0x1a   :  { %1026 = vsyncadd [#allocation9], 4294950912 }
  0x1b   :  { %1027 = dma.done.wait [#allocation12], 8192  }
  0x1c   :  { %1028 = vsyncadd [#allocation12], 4294959104  ;;  %v170_v0 = vld [vmem:[#allocation8 + $0xf8] sm:$0xff]  ;;  %v168_v1 = vld [vmem:[#allocation8 + $0xe8] sm:$0xff]  ;;  %s743_s1 = sshll.u32 %s1176_s9, 4  ;;  %s756_s15 = sshll.u32 %s1177_s10, 4  ;;  %s744_s1 = int_to_ptr.hbm [resolvable:$true] %s743_s1  ;;  %s757_s15 = int_to_ptr.hbm [resolvable:$true] %s756_s15 }
  0x1d   :  { %v202_v2 = vld [vmem:[#allocation8 + $0x1f8] sm:$0xff]  ;;  %267 = vmatpush.msra.mxu2 %v170_v0  ;;  %v200_v3 = vld [vmem:[#allocation8 + $0x1e8] sm:$0xff]  ;;  %v169_v4 = vld [vmem:[#allocation8 + $0xf0] sm:$0xff]  ;;  %s769_s19 = sshll.u32 %s1178_s11, 4  ;;  %s770_s19 = int_to_ptr.hbm [resolvable:$true] %s769_s19 }
  0x1e   :  { %296 = vmatpush.msra.mxu3 %v202_v2  ;;  %v166_v5 = vld [vmem:[#allocation8 + $0xd8] sm:$0xff]  ;;  %209 = vmatpush.msra.mxu0 %v169_v4  ;;  %v167_v7 = vld [vmem:[#allocation8 + $0xe0] sm:$0xff]  ;;  %v164_v8 = vld [vmem:[#allocation8 + $0xc8] sm:$0xff] }
  0x1f   :  { %v198_v6 = vld [vmem:[#allocation8 + $0x1d8] sm:$0xff]  ;;  %268 = vmatpush.msra.mxu2 %v168_v1  ;;  %v201_v9 = vld [vmem:[#allocation8 + $0x1f0] sm:$0xff]  ;;  %v196_v10 = vld [vmem:[#allocation8 + $0x1c8] sm:$0xff] }
  0x20   :  { %297 = vmatpush.msra.mxu3 %v200_v3  ;;  %210 = vmatpush.msra.mxu0 %v167_v7  ;;  %v165_v11 = vld [vmem:[#allocation8 + $0xd0] sm:$0xff]  ;;  %v199_v12 = vld [vmem:[#allocation8 + $0x1e0] sm:$0xff]  ;;  %v162_v15 = vld [vmem:[#allocation8 + $0xb8] sm:$0xff] }
  0x21   :  { %238 = vmatpush.msra.mxu1 %v201_v9  ;;  %269 = vmatpush.msra.mxu2 %v166_v5  ;;  %v163_v13 = vld [vmem:[#allocation8 + $0xc0] sm:$0xff]  ;;  %v197_v14 = vld [vmem:[#allocation8 + $0x1d0] sm:$0xff]  ;;  %v194_v16 = vld [vmem:[#allocation8 + $0x1b8] sm:$0xff] }
  0x22   :  { %298 = vmatpush.msra.mxu3 %v198_v6  ;;  %211 = vmatpush.msra.mxu0 %v165_v11  ;;  %v161_v17 = vld [vmem:[#allocation8 + $0xb0] sm:$0xff]  ;;  %v195_v18 = vld [vmem:[#allocation8 + $0x1c0] sm:$0xff]  ;;  %v160_v19 = vld [vmem:[#allocation8 + $0xa8] sm:$0xff] }
  0x23   :  { %239 = vmatpush.msra.mxu1 %v199_v12  ;;  %270 = vmatpush.msra.mxu2 %v164_v8  ;;  %v192_v20 = vld [vmem:[#allocation8 + $0x1a8] sm:$0xff]  ;;  %v159_v21 = vld [vmem:[#allocation8 + $0xa0] sm:$0xff]  ;;  %v193_v22 = vld [vmem:[#allocation8 + $0x1b0] sm:$0xff] }
  0x24   :  { %299 = vmatpush.msra.mxu3 %v196_v10  ;;  %212 = vmatpush.msra.mxu0 %v163_v13  ;;  %v158_v23 = vld [vmem:[#allocation8 + $0x98] sm:$0xff]  ;;  %v157_v25 = vld [vmem:[#allocation8 + $0x90] sm:$0xff]  ;;  %v191_v26 = vld [vmem:[#allocation8 + $0x1a0] sm:$0xff] }
  0x25   :  { %240 = vmatpush.msra.mxu1 %v197_v14  ;;  %271 = vmatpush.msra.mxu2 %v162_v15  ;;  %v190_v24 = vld [vmem:[#allocation8 + $0x198] sm:$0xff]  ;;  %v156_v27 = vld [vmem:[#allocation8 + $0x88] sm:$0xff]  ;;  %v155_v29 = vld [vmem:[#allocation8 + $0x80] sm:$0xff] }
  0x26   :  { %300 = vmatpush.msra.mxu3 %v194_v16  ;;  %213 = vmatpush.msra.mxu0 %v161_v17  ;;  %v188_v28 = vld [vmem:[#allocation8 + $0x188] sm:$0xff]  ;;  %v189_v30 = vld [vmem:[#allocation8 + $0x190] sm:$0xff]  ;;  %v154_v31 = vld [vmem:[#allocation8 + $0x78] sm:$0xff] }
  0x27   :  { %241 = vmatpush.msra.mxu1 %v195_v18  ;;  %272 = vmatpush.msra.mxu2 %v160_v19  ;;  %v186_v32 = vld [vmem:[#allocation8 + $0x178] sm:$0xff]  ;;  %v153_v33 = vld [vmem:[#allocation8 + $0x70] sm:$0xff]  ;;  %v187_v34 = vld [vmem:[#allocation8 + $0x180] sm:$0xff] }
  0x28   :  { %301 = vmatpush.msra.mxu3 %v192_v20  ;;  %214 = vmatpush.msra.mxu0 %v159_v21  ;;  %v152_v35 = vld [vmem:[#allocation8 + $0x68] sm:$0xff]  ;;  %v151_v37 = vld [vmem:[#allocation8 + $0x60] sm:$0xff]  ;;  %v185_v38 = vld [vmem:[#allocation8 + $0x170] sm:$0xff] }
  0x29   :  { %242 = vmatpush.msra.mxu1 %v193_v22  ;;  %273 = vmatpush.msra.mxu2 %v158_v23  ;;  %v184_v36 = vld [vmem:[#allocation8 + $0x168] sm:$0xff]  ;;  %v150_v39 = vld [vmem:[#allocation8 + $0x58] sm:$0xff]  ;;  %v149_v41 = vld [vmem:[#allocation8 + $0x50] sm:$0xff] }
  0x2a   :  { %302 = vmatpush.msra.mxu3 %v190_v24  ;;  %215 = vmatpush.msra.mxu0 %v157_v25  ;;  %v182_v40 = vld [vmem:[#allocation8 + $0x158] sm:$0xff]  ;;  %v183_v42 = vld [vmem:[#allocation8 + $0x160] sm:$0xff]  ;;  %v148_v43 = vld [vmem:[#allocation8 + $0x48] sm:$0xff] }
  0x2b   :  { %243 = vmatpush.msra.mxu1 %v191_v26  ;;  %274 = vmatpush.msra.mxu2 %v156_v27  ;;  %v180_v44 = vld [vmem:[#allocation8 + $0x148] sm:$0xff]  ;;  %v147_v45 = vld [vmem:[#allocation8 + $0x40] sm:$0xff]  ;;  %v181_v46 = vld [vmem:[#allocation8 + $0x150] sm:$0xff] }
  0x2c   :  { %303 = vmatpush.msra.mxu3 %v188_v28  ;;  %216 = vmatpush.msra.mxu0 %v155_v29  ;;  %v146_v47 = vld [vmem:[#allocation8 + $0x38] sm:$0xff]  ;;  %v145_v49 = vld [vmem:[#allocation8 + $0x30] sm:$0xff]  ;;  %v179_v50 = vld [vmem:[#allocation8 + $0x140] sm:$0xff] }
  0x2d   :  { %244 = vmatpush.msra.mxu1 %v189_v30  ;;  %275 = vmatpush.msra.mxu2 %v154_v31  ;;  %v178_v48 = vld [vmem:[#allocation8 + $0x138] sm:$0xff]  ;;  %v144_v51 = vld [vmem:[#allocation8 + $0x28] sm:$0xff]  ;;  %v143_v53 = vld [vmem:[#allocation8 + $0x20] sm:$0xff] }
  0x2e   :  { %304 = vmatpush.msra.mxu3 %v186_v32  ;;  %217 = vmatpush.msra.mxu0 %v153_v33  ;;  %v176_v52 = vld [vmem:[#allocation8 + $0x128] sm:$0xff]  ;;  %v177_v54 = vld [vmem:[#allocation8 + $0x130] sm:$0xff]  ;;  %v142_v55 = vld [vmem:[#allocation8 + $0x18] sm:$0xff] }
  0x2f   :  { %245 = vmatpush.msra.mxu1 %v187_v34  ;;  %276 = vmatpush.msra.mxu2 %v152_v35  ;;  %v174_v56 = vld [vmem:[#allocation8 + $0x118] sm:$0xff]  ;;  %v141_v57 = vld [vmem:[#allocation8 + $0x10] sm:$0xff]  ;;  %v175_v58 = vld [vmem:[#allocation8 + $0x120] sm:$0xff] }
  0x30   :  { %305 = vmatpush.msra.mxu3 %v184_v36  ;;  %218 = vmatpush.msra.mxu0 %v151_v37  ;;  %v140_v59 = vld [vmem:[#allocation8 + $0x8] sm:$0xff]  ;;  %v131_v61 = vld [vmem:[#allocation2] sm:$0xff]  ;;  %v372_v63 = vld [vmem:[#allocation10 + $0xf8] sm:$0xff] }
  0x31   :  { %246 = vmatpush.msra.mxu1 %v185_v38  ;;  %277 = vmatpush.msra.mxu2 %v150_v39  ;;  %v172_v60 = vld [vmem:[#allocation8 + $0x108] sm:$0xff]  ;;  %v404_v0 = vld [vmem:[#allocation10 + $0x1f8] sm:$0xff]  ;;  %v139_v1 = vld [vmem:[#allocation8] sm:$0xff] }
  0x32   :  { %306 = vmatpush.msra.mxu3 %v182_v40  ;;  %219 = vmatpush.msra.mxu0 %v149_v41  ;;  %v132_v62 = vld [vmem:[#allocation2 + $0x8] sm:$0xff]  ;;  %v173_v2 = vld [vmem:[#allocation8 + $0x110] sm:$0xff]  ;;  %v171_v5 = vld [vmem:[#allocation8 + $0x100] sm:$0xff] }
  0x33   :  { %247 = vmatpush.msra.mxu1 %v183_v42  ;;  %278 = vmatpush.msra.mxu2 %v148_v43  ;;  %v370_v3 = vld [vmem:[#allocation10 + $0xe8] sm:$0xff]  ;;  %v368_v6 = vld [vmem:[#allocation10 + $0xd8] sm:$0xff]  ;;  %v371_v7 = vld [vmem:[#allocation10 + $0xf0] sm:$0xff] }
  0x34   :  { %307 = vmatpush.msra.mxu3 %v180_v44  ;;  %220 = vmatpush.msra.mxu0 %v147_v45  ;;  %v402_v4 = vld [vmem:[#allocation10 + $0x1e8] sm:$0xff]  ;;  %v400_v8 = vld [vmem:[#allocation10 + $0x1d8] sm:$0xff]  ;;  %v369_v10 = vld [vmem:[#allocation10 + $0xe0] sm:$0xff] }
  0x35   :  { %248 = vmatpush.msra.mxu1 %v181_v46  ;;  %279 = vmatpush.msra.mxu2 %v146_v47  ;;  %v366_v9 = vld [vmem:[#allocation10 + $0xc8] sm:$0xff]  ;;  %v133_v11 = vld [vmem:[#allocation2 + $0x10] sm:$0xff]  ;;  %v364_v13 = vld [vmem:[#allocation10 + $0xb8] sm:$0xff] }
  0x36   :  { %308 = vmatpush.msra.mxu3 %v178_v48  ;;  %221 = vmatpush.msra.mxu0 %v145_v49  ;;  %v403_v12 = vld [vmem:[#allocation10 + $0x1f0] sm:$0xff]  ;;  %v398_v14 = vld [vmem:[#allocation10 + $0x1c8] sm:$0xff]  ;;  %v134_v15 = vld [vmem:[#allocation2 + $0x18] sm:$0xff] }
  0x37   :  { %249 = vmatpush.msra.mxu1 %v179_v50  ;;  %280 = vmatpush.msra.mxu2 %v144_v51  ;;  %v367_v16 = vld [vmem:[#allocation10 + $0xd0] sm:$0xff]  ;;  %v401_v17 = vld [vmem:[#allocation10 + $0x1e0] sm:$0xff]  ;;  %v362_v18 = vld [vmem:[#allocation10 + $0xa8] sm:$0xff] }
  0x38   :  { %309 = vmatpush.msra.mxu3 %v176_v52  ;;  %222 = vmatpush.msra.mxu0 %v143_v53  ;;  %v396_v19 = vld [vmem:[#allocation10 + $0x1b8] sm:$0xff]  ;;  %v365_v20 = vld [vmem:[#allocation10 + $0xc0] sm:$0xff]  ;;  %v399_v21 = vld [vmem:[#allocation10 + $0x1d0] sm:$0xff] }
  0x39   :  { %250 = vmatpush.msra.mxu1 %v177_v54  ;;  %281 = vmatpush.msra.mxu2 %v142_v55  ;;  %v360_v22 = vld [vmem:[#allocation10 + $0x98] sm:$0xff]  ;;  %v394_v23 = vld [vmem:[#allocation10 + $0x1a8] sm:$0xff]  ;;  %v363_v24 = vld [vmem:[#allocation10 + $0xb0] sm:$0xff] }
  0x3a   :  { %310 = vmatpush.msra.mxu3 %v174_v56  ;;  %223 = vmatpush.msra.mxu0 %v141_v57  ;;  %v397_v25 = vld [vmem:[#allocation10 + $0x1c0] sm:$0xff]  ;;  %v358_v26 = vld [vmem:[#allocation10 + $0x88] sm:$0xff]  ;;  %v392_v27 = vld [vmem:[#allocation10 + $0x198] sm:$0xff] }
  0x3b   :  { %251 = vmatpush.msra.mxu1 %v175_v58  ;;  %282 = vmatpush.msra.mxu2 %v140_v59  ;;  %v135_v28 = vld [vmem:[#allocation2 + $0x20] sm:$0xff]  ;;  %v395_v30 = vld [vmem:[#allocation10 + $0x1b0] sm:$0xff]  ;;  %v356_v31 = vld [vmem:[#allocation10 + $0x78] sm:$0xff] }
  0x3c   :  { %311 = vmatpush.msra.mxu3 %v172_v60  ;;  %283 = vmatmul.f32.vlgmr.msra.gmra.mxu2 %v131_v61  ;;  %v361_v29 = vld [vmem:[#allocation10 + $0xa0] sm:$0xff]  ;;  %v390_v32 = vld [vmem:[#allocation10 + $0x188] sm:$0xff]  ;;  %v359_v34 = vld [vmem:[#allocation10 + $0x90] sm:$0xff] }
  0x3d   :  { %312 = vmatmul.f32.vlgmr.msra.gmra.mxu3 %v132_v62  ;;  %469 = vmatpush.msrb.mxu2 %v372_v63  ;;  %v136_v33 = vld [vmem:[#allocation2 + $0x28] sm:$0xff]  ;;  %v393_v35 = vld [vmem:[#allocation10 + $0x1a0] sm:$0xff]  ;;  %v388_v37 = vld [vmem:[#allocation10 + $0x178] sm:$0xff] }
  0x3e   :  { %498 = vmatpush.msrb.mxu3 %v404_v0  ;;  %224 = vmatpush.msra.mxu0 %v139_v1  ;;  %v354_v36 = vld [vmem:[#allocation10 + $0x68] sm:$0xff]  ;;  %v357_v38 = vld [vmem:[#allocation10 + $0x80] sm:$0xff]  ;;  %v391_v39 = vld [vmem:[#allocation10 + $0x190] sm:$0xff] }
  0x3f   :  { %252 = vmatpush.msra.mxu1 %v173_v2  ;;  %470 = vmatpush.msrb.mxu2 %v370_v3  ;;  %v352_v40 = vld [vmem:[#allocation10 + $0x58] sm:$0xff]  ;;  %v386_v41 = vld [vmem:[#allocation10 + $0x168] sm:$0xff]  ;;  %v355_v42 = vld [vmem:[#allocation10 + $0x70] sm:$0xff] }
  0x40   :  { %499 = vmatpush.msrb.mxu3 %v402_v4  ;;  %225 = vmatmul.f32.vlgmr.msra.gmra.mxu0 %v131_v61  ;;  %v389_v43 = vld [vmem:[#allocation10 + $0x180] sm:$0xff]  ;;  %v350_v44 = vld [vmem:[#allocation10 + $0x48] sm:$0xff]  ;;  %v384_v45 = vld [vmem:[#allocation10 + $0x158] sm:$0xff] }
  0x41   :  { %253 = vmatpush.msra.mxu1 %v171_v5  ;;  %471 = vmatpush.msrb.mxu2 %v368_v6  ;;  %v137_v46 = vld [vmem:[#allocation2 + $0x30] sm:$0xff]  ;;  %v353_v47 = vld [vmem:[#allocation10 + $0x60] sm:$0xff]  ;;  %v348_v49 = vld [vmem:[#allocation10 + $0x38] sm:$0xff] }
  0x42   :  { %411 = vmatpush.msrb.mxu0 %v371_v7  ;;  %500 = vmatpush.msrb.mxu3 %v400_v8  ;;  %v387_v48 = vld [vmem:[#allocation10 + $0x170] sm:$0xff]  ;;  %v382_v50 = vld [vmem:[#allocation10 + $0x148] sm:$0xff]  ;;  %v138_v51 = vld [vmem:[#allocation2 + $0x38] sm:$0xff] }
  0x43   :  { %254 = vmatmul.f32.vlgmr.msra.gmra.mxu1 %v132_v62  ;;  %472 = vmatpush.msrb.mxu2 %v366_v9  ;;  %v351_v52 = vld [vmem:[#allocation10 + $0x50] sm:$0xff]  ;;  %v385_v53 = vld [vmem:[#allocation10 + $0x160] sm:$0xff]  ;;  %v346_v54 = vld [vmem:[#allocation10 + $0x28] sm:$0xff] }
  0x44   :  { %412 = vmatpush.msrb.mxu0 %v369_v10  ;;  %286 = vmatmul.f32.gmra.mxu2 %v133_v11  ;;  %v380_v55 = vld [vmem:[#allocation10 + $0x138] sm:$0xff]  ;;  %v349_v56 = vld [vmem:[#allocation10 + $0x40] sm:$0xff]  ;;  %v383_v57 = vld [vmem:[#allocation10 + $0x150] sm:$0xff] }
  0x45   :  { %440 = vmatpush.msrb.mxu1 %v403_v12  ;;  %473 = vmatpush.msrb.mxu2 %v364_v13  ;;  %v344_v58 = vld [vmem:[#allocation10 + $0x18] sm:$0xff]  ;;  %v378_v59 = vld [vmem:[#allocation10 + $0x128] sm:$0xff]  ;;  %v347_v60 = vld [vmem:[#allocation10 + $0x30] sm:$0xff] }
  0x46   :  { %501 = vmatpush.msrb.mxu3 %v398_v14  ;;  %413 = vmatpush.msrb.mxu0 %v367_v16  ;;  %v381_v61 = vld [vmem:[#allocation10 + $0x140] sm:$0xff]  ;;  %v342_v62 = vld [vmem:[#allocation10 + $0x8] sm:$0xff]  ;;  %v376_v63 = vld [vmem:[#allocation10 + $0x118] sm:$0xff] }
  0x47   :  { %315 = vmatmul.f32.gmra.mxu3 %v134_v15  ;;  %441 = vmatpush.msrb.mxu1 %v401_v17  ;;  %v345_v0 = vld [vmem:[#allocation10 + $0x20] sm:$0xff]  ;;  %v379_v1 = vld [vmem:[#allocation10 + $0x130] sm:$0xff]  ;;  %v374_v3 = vld [vmem:[#allocation10 + $0x108] sm:$0xff] }
  0x48   :  { %474 = vmatpush.msrb.mxu2 %v362_v18  ;;  %502 = vmatpush.msrb.mxu3 %v396_v19  ;;  %v333_v2 = vld [vmem:[#allocation5] sm:$0xff]  ;;  %v574_v4 = vld [vmem:[#allocation11 + $0xf8] sm:$0xff]  ;;  %v343_v5 = vld [vmem:[#allocation10 + $0x10] sm:$0xff] }
  0x49   :  { %414 = vmatpush.msrb.mxu0 %v365_v20  ;;  %442 = vmatpush.msrb.mxu1 %v399_v21  ;;  %v377_v6 = vld [vmem:[#allocation10 + $0x120] sm:$0xff]  ;;  %v334_v7 = vld [vmem:[#allocation5 + $0x8] sm:$0xff]  ;;  %v606_v9 = vld [vmem:[#allocation11 + $0x1f8] sm:$0xff] }
  0x4a   :  { %475 = vmatpush.msrb.mxu2 %v360_v22  ;;  %503 = vmatpush.msrb.mxu3 %v394_v23  ;;  %v572_v8 = vld [vmem:[#allocation11 + $0xe8] sm:$0xff]  ;;  %v341_v10 = vld [vmem:[#allocation10] sm:$0xff]  ;;  %v570_v12 = vld [vmem:[#allocation11 + $0xd8] sm:$0xff] }
  0x4b   :  { %228 = vmatmul.f32.gmra.mxu0 %v133_v11  ;;  %443 = vmatpush.msrb.mxu1 %v397_v25  ;;  %v375_v11 = vld [vmem:[#allocation10 + $0x110] sm:$0xff]  ;;  %v604_v13 = vld [vmem:[#allocation11 + $0x1e8] sm:$0xff]  ;;  %v373_v14 = vld [vmem:[#allocation10 + $0x100] sm:$0xff] }
  0x4c   :  { %415 = vmatpush.msrb.mxu0 %v363_v24  ;;  %476 = vmatpush.msrb.mxu2 %v358_v26  ;;  %v568_v16 = vld [vmem:[#allocation11 + $0xc8] sm:$0xff]  ;;  %v602_v17 = vld [vmem:[#allocation11 + $0x1d8] sm:$0xff]  ;;  %v335_v18 = vld [vmem:[#allocation5 + $0x10] sm:$0xff] }
  0x4d   :  { %504 = vmatpush.msrb.mxu3 %v392_v27  ;;  %257 = vmatmul.f32.gmra.mxu1 %v134_v15  ;;  %v573_v15 = vld [vmem:[#allocation11 + $0xf0] sm:$0xff]  ;;  %v571_v19 = vld [vmem:[#allocation11 + $0xe0] sm:$0xff]  ;;  %v566_v21 = vld [vmem:[#allocation11 + $0xb8] sm:$0xff] }
  0x4e   :  { %289 = vmatmul.f32.gmra.mxu2 %v135_v28  ;;  %416 = vmatpush.msrb.mxu0 %v361_v29  ;;  %v605_v20 = vld [vmem:[#allocation11 + $0x1f0] sm:$0xff]  ;;  %v600_v22 = vld [vmem:[#allocation11 + $0x1c8] sm:$0xff]  ;;  %v336_v23 = vld [vmem:[#allocation5 + $0x18] sm:$0xff] }
  0x4f   :  { %444 = vmatpush.msrb.mxu1 %v395_v30  ;;  %477 = vmatpush.msrb.mxu2 %v356_v31  ;;  %v569_v24 = vld [vmem:[#allocation11 + $0xd0] sm:$0xff]  ;;  %v603_v25 = vld [vmem:[#allocation11 + $0x1e0] sm:$0xff]  ;;  %v564_v26 = vld [vmem:[#allocation11 + $0xa8] sm:$0xff] }
  0x50   :  { %505 = vmatpush.msrb.mxu3 %v390_v32  ;;  %417 = vmatpush.msrb.mxu0 %v359_v34  ;;  %v598_v27 = vld [vmem:[#allocation11 + $0x1b8] sm:$0xff]  ;;  %v601_v29 = vld [vmem:[#allocation11 + $0x1d0] sm:$0xff]  ;;  %v596_v31 = vld [vmem:[#allocation11 + $0x1a8] sm:$0xff] }
  0x51   :  { %318 = vmatmul.f32.gmra.mxu3 %v136_v33  ;;  %445 = vmatpush.msrb.mxu1 %v393_v35  ;;  %v562_v30 = vld [vmem:[#allocation11 + $0x98] sm:$0xff]  ;;  %v565_v32 = vld [vmem:[#allocation11 + $0xb0] sm:$0xff]  ;;  %v560_v34 = vld [vmem:[#allocation11 + $0x88] sm:$0xff] }
  0x52   :  { %478 = vmatpush.msrb.mxu2 %v354_v36  ;;  %506 = vmatpush.msrb.mxu3 %v388_v37  ;;  %v594_v35 = vld [vmem:[#allocation11 + $0x198] sm:$0xff]  ;;  %v337_v36 = vld [vmem:[#allocation5 + $0x20] sm:$0xff] }
  0x53   :  { %418 = vmatpush.msrb.mxu0 %v357_v38  ;;  %446 = vmatpush.msrb.mxu1 %v391_v39  ;;  %v563_v37 = vld [vmem:[#allocation11 + $0xa0] sm:$0xff]  ;;  %v597_v38 = vld [vmem:[#allocation11 + $0x1b0] sm:$0xff]  ;;  %v558_v39 = vld [vmem:[#allocation11 + $0x78] sm:$0xff] }
  0x54   :  { %479 = vmatpush.msrb.mxu2 %v352_v40  ;;  %507 = vmatpush.msrb.mxu3 %v386_v41  ;;  %v592_v40 = vld [vmem:[#allocation11 + $0x188] sm:$0xff] }
  0x55   :  { %231 = vmatmul.f32.gmra.mxu0 %v135_v28  ;;  %447 = vmatpush.msrb.mxu1 %v389_v43  ;;  %v567_v28 = vld [vmem:[#allocation11 + $0xc0] sm:$0xff]  ;;  %v338_v41 = vld [vmem:[#allocation5 + $0x28] sm:$0xff] }
  0x56   :  { %419 = vmatpush.msrb.mxu0 %v355_v42  ;;  %480 = vmatpush.msrb.mxu2 %v350_v44  ;;  %v561_v42 = vld [vmem:[#allocation11 + $0x90] sm:$0xff]  ;;  %v595_v43 = vld [vmem:[#allocation11 + $0x1a0] sm:$0xff]  ;;  %v556_v44 = vld [vmem:[#allocation11 + $0x68] sm:$0xff] }
  0x57   :  { %508 = vmatpush.msrb.mxu3 %v384_v45  ;;  %260 = vmatmul.f32.gmra.mxu1 %v136_v33  ;;  %v599_v33 = vld [vmem:[#allocation11 + $0x1c0] sm:$0xff]  ;;  %v590_v45 = vld [vmem:[#allocation11 + $0x178] sm:$0xff] }
  0x58   :  { %292 = vmatmul.f32.gmra.mxu2 %v137_v46  ;;  %420 = vmatpush.msrb.mxu0 %v353_v47  ;;  %v593_v47 = vld [vmem:[#allocation11 + $0x190] sm:$0xff] }
  0x59   :  { %448 = vmatpush.msrb.mxu1 %v387_v48  ;;  %481 = vmatpush.msrb.mxu2 %v348_v49  ;;  %v554_v48 = vld [vmem:[#allocation11 + $0x58] sm:$0xff]  ;;  %v588_v49 = vld [vmem:[#allocation11 + $0x168] sm:$0xff] }
  0x5a   :  { %509 = vmatpush.msrb.mxu3 %v382_v50  ;;  %421 = vmatpush.msrb.mxu0 %v351_v52  ;;  %v557_v50 = vld [vmem:[#allocation11 + $0x70] sm:$0xff]  ;;  %v552_v52 = vld [vmem:[#allocation11 + $0x48] sm:$0xff] }
  0x5b   :  { %321 = vmatmul.f32.gmra.mxu3 %v138_v51  ;;  %449 = vmatpush.msrb.mxu1 %v385_v53  ;;  %v586_v53 = vld [vmem:[#allocation11 + $0x158] sm:$0xff] }
  0x5c   :  { %482 = vmatpush.msrb.mxu2 %v346_v54  ;;  %510 = vmatpush.msrb.mxu3 %v380_v55  ;;  %v339_v54 = vld [vmem:[#allocation5 + $0x30] sm:$0xff]  ;;  %v555_v55 = vld [vmem:[#allocation11 + $0x60] sm:$0xff] }
  0x5d   :  { %422 = vmatpush.msrb.mxu0 %v349_v56  ;;  %450 = vmatpush.msrb.mxu1 %v383_v57  ;;  %v589_v56 = vld [vmem:[#allocation11 + $0x170] sm:$0xff]  ;;  %v550_v57 = vld [vmem:[#allocation11 + $0x38] sm:$0xff] }
  0x5e   :  { %483 = vmatpush.msrb.mxu2 %v344_v58  ;;  %511 = vmatpush.msrb.mxu3 %v378_v59  ;;  %v584_v58 = vld [vmem:[#allocation11 + $0x148] sm:$0xff]  ;;  %v340_v59 = vld [vmem:[#allocation5 + $0x38] sm:$0xff] }
  0x5f   :  { %234 = vmatmul.f32.gmra.mxu0 %v137_v46  ;;  %451 = vmatpush.msrb.mxu1 %v381_v61  ;;  %v559_v46 = vld [vmem:[#allocation11 + $0x80] sm:$0xff] }
  0x60   :  { %423 = vmatpush.msrb.mxu0 %v347_v60  ;;  %484 = vmatpush.msrb.mxu2 %v342_v62  ;;  %v553_v60 = vld [vmem:[#allocation11 + $0x50] sm:$0xff]  ;;  %v587_v61 = vld [vmem:[#allocation11 + $0x160] sm:$0xff]  ;;  %v548_v62 = vld [vmem:[#allocation11 + $0x28] sm:$0xff] }
  0x61   :  { %512 = vmatpush.msrb.mxu3 %v376_v63  ;;  %263 = vmatmul.f32.gmra.mxu1 %v138_v51  ;;  %v591_v51 = vld [vmem:[#allocation11 + $0x180] sm:$0xff]  ;;  %v582_v63 = vld [vmem:[#allocation11 + $0x138] sm:$0xff] }
  0x62   :  { %424 = vmatpush.msrb.mxu0 %v345_v0  ;;  %452 = vmatpush.msrb.mxu1 %v379_v1  ;;  %v551_v0 = vld [vmem:[#allocation11 + $0x40] sm:$0xff]  ;;  %v585_v1 = vld [vmem:[#allocation11 + $0x150] sm:$0xff] }
  0x63   :  { %485 = vmatmul.f32.vlgmr.msrb.gmra.mxu2 %v333_v2  ;;  %513 = vmatpush.msrb.mxu3 %v374_v3  ;;  %v580_v3 = vld [vmem:[#allocation11 + $0x128] sm:$0xff] }
  0x64   :  { %671 = vmatpush.msra.mxu2 %v574_v4  ;;  %425 = vmatpush.msrb.mxu0 %v343_v5  ;;  %v549_v4 = vld [vmem:[#allocation11 + $0x30] sm:$0xff]  ;;  %v583_v5 = vld [vmem:[#allocation11 + $0x140] sm:$0xff] }
  0x65   :  { %453 = vmatpush.msrb.mxu1 %v377_v6  ;;  %514 = vmatmul.f32.vlgmr.msrb.gmra.mxu3 %v334_v7  ;;  %v544_v6 = vld [vmem:[#allocation11 + $0x8] sm:$0xff] }
  0x66   :  { %672 = vmatpush.msra.mxu2 %v572_v8  ;;  %700 = vmatpush.msra.mxu3 %v606_v9  ;;  %v547_v8 = vld [vmem:[#allocation11 + $0x20] sm:$0xff]  ;;  %v581_v9 = vld [vmem:[#allocation11 + $0x130] sm:$0xff] }
  0x67   :  { %426 = vmatpush.msrb.mxu0 %v341_v10  ;;  %454 = vmatpush.msrb.mxu1 %v375_v11  ;;  %v535_v10 = vld [vmem:[#allocation7] sm:$0xff]  ;;  %v576_v11 = vld [vmem:[#allocation11 + $0x108] sm:$0xff] }
  0x68   :  { %673 = vmatpush.msra.mxu2 %v570_v12  ;;  %701 = vmatpush.msra.mxu3 %v604_v13  ;;  %v545_v12 = vld [vmem:[#allocation11 + $0x10] sm:$0xff]  ;;  %v579_v13 = vld [vmem:[#allocation11 + $0x120] sm:$0xff] }
  0x69   :  { %427 = vmatmul.f32.vlgmr.msrb.gmra.mxu0 %v333_v2  ;;  %455 = vmatpush.msrb.mxu1 %v373_v14  ;;  %v546_v2 = vld [vmem:[#allocation11 + $0x18] sm:$0xff]  ;;  %v536_v14 = vld [vmem:[#allocation7 + $0x8] sm:$0xff] }
  0x6a   :  { %613 = vmatpush.msra.mxu0 %v573_v15  ;;  %674 = vmatpush.msra.mxu2 %v568_v16  ;;  %v543_v15 = vld [vmem:[#allocation11] sm:$0xff]  ;;  %v577_v16 = vld [vmem:[#allocation11 + $0x110] sm:$0xff] }
  0x6b   :  { %702 = vmatpush.msra.mxu3 %v602_v17  ;;  %456 = vmatmul.f32.vlgmr.msrb.gmra.mxu1 %v334_v7  ;;  %v578_v7 = vld [vmem:[#allocation11 + $0x118] sm:$0xff]  ;;  %v575_v17 = vld [vmem:[#allocation11 + $0x100] sm:$0xff] }
  0x6c   :  { %488 = vmatmul.f32.gmra.mxu2 %v335_v18  ;;  %614 = vmatpush.msra.mxu0 %v571_v19  ;;  %v538_v19 = vld [vmem:[#allocation7 + $0x18] sm:$0xff] }
  0x6d   :  { %642 = vmatpush.msra.mxu1 %v605_v20  ;;  %675 = vmatpush.msra.mxu2 %v566_v21  ;;  %v539_v20 = vld [vmem:[#allocation7 + $0x20] sm:$0xff]  ;;  %v540_v21 = vld [vmem:[#allocation7 + $0x28] sm:$0xff] }
  0x6e   :  { %703 = vmatpush.msra.mxu3 %v600_v22  ;;  %615 = vmatpush.msra.mxu0 %v569_v24  ;;  %v541_v22 = vld [vmem:[#allocation7 + $0x30] sm:$0xff]  ;;  %v203_v24 = vld [vmem:[%s1173_s6] sm:$0x3]  ;;  %s1041_s6 = smov [#allocation13]  }
  0x6f   :  { %517 = vmatmul.f32.gmra.mxu3 %v336_v23  ;;  %643 = vmatpush.msra.mxu1 %v603_v25  ;;  %v205_v25 = vperm.slane %v203_v24, 0  ;;  %s741_s28 = sshll.u32 %s1041_s6, 4  ;;  %s742_s28 = int_to_ptr.vmem [resolvable:$true] %s741_s28 }
  0x70   :  { %676 = vmatpush.msra.mxu2 %v564_v26  ;;  %704 = vmatpush.msra.mxu3 %v598_v27  ;;  %v206_v26 = vperm.slane %v203_v24, 1 }
  0x71   :  { %616 = vmatpush.msra.mxu0 %v567_v28  ;;  %644 = vmatpush.msra.mxu1 %v601_v29 }
  0x72   :  { %677 = vmatpush.msra.mxu2 %v562_v30  ;;  %705 = vmatpush.msra.mxu3 %v596_v31 }
  0x73   :  { %430 = vmatmul.f32.gmra.mxu0 %v335_v18  ;;  %645 = vmatpush.msra.mxu1 %v599_v33  ;;  %v537_v18 = vld [vmem:[#allocation7 + $0x10] sm:$0xff] }
  0x74   :  { %617 = vmatpush.msra.mxu0 %v565_v32  ;;  %678 = vmatpush.msra.mxu2 %v560_v34 }
  0x75   :  { %706 = vmatpush.msra.mxu3 %v594_v35  ;;  %459 = vmatmul.f32.gmra.mxu1 %v336_v23  ;;  %v542_v23 = vld [vmem:[#allocation7 + $0x38] sm:$0xff] }
  0x76   :  { %491 = vmatmul.f32.gmra.mxu2 %v337_v36  ;;  %618 = vmatpush.msra.mxu0 %v563_v37 }
  0x77   :  { %646 = vmatpush.msra.mxu1 %v597_v38  ;;  %679 = vmatpush.msra.mxu2 %v558_v39 }
  0x78   :  { %707 = vmatpush.msra.mxu3 %v592_v40  ;;  %619 = vmatpush.msra.mxu0 %v561_v42 }
  0x79   :  { %520 = vmatmul.f32.gmra.mxu3 %v338_v41  ;;  %647 = vmatpush.msra.mxu1 %v595_v43 }
  0x7a   :  { %680 = vmatpush.msra.mxu2 %v556_v44  ;;  %708 = vmatpush.msra.mxu3 %v590_v45 }
  0x7b   :  { %620 = vmatpush.msra.mxu0 %v559_v46  ;;  %648 = vmatpush.msra.mxu1 %v593_v47 }
  0x7c   :  { %681 = vmatpush.msra.mxu2 %v554_v48  ;;  %709 = vmatpush.msra.mxu3 %v588_v49 }
  0x7d   :  { %433 = vmatmul.f32.gmra.mxu0 %v337_v36  ;;  %649 = vmatpush.msra.mxu1 %v591_v51 }
  0x7e   :  { %621 = vmatpush.msra.mxu0 %v557_v50  ;;  %682 = vmatpush.msra.mxu2 %v552_v52 }
  0x7f   :  { %710 = vmatpush.msra.mxu3 %v586_v53  ;;  %462 = vmatmul.f32.gmra.mxu1 %v338_v41 }
  0x80   :  { %494 = vmatmul.f32.gmra.mxu2 %v339_v54  ;;  %622 = vmatpush.msra.mxu0 %v555_v55 }
  0x81   :  { %650 = vmatpush.msra.mxu1 %v589_v56  ;;  %683 = vmatpush.msra.mxu2 %v550_v57 }
  0x82   :  { %711 = vmatpush.msra.mxu3 %v584_v58  ;;  %623 = vmatpush.msra.mxu0 %v553_v60 }
  0x83   :  { %523 = vmatmul.f32.gmra.mxu3 %v340_v59  ;;  %651 = vmatpush.msra.mxu1 %v587_v61 }
  0x84   :  { %684 = vmatpush.msra.mxu2 %v548_v62  ;;  %712 = vmatpush.msra.mxu3 %v582_v63 }
  0x85   :  { %624 = vmatpush.msra.mxu0 %v551_v0  ;;  %652 = vmatpush.msra.mxu1 %v585_v1 }
  0x86   :  { %685 = vmatpush.msra.mxu2 %v546_v2  ;;  %713 = vmatpush.msra.mxu3 %v580_v3 }
  0x87   :  { %436 = vmatmul.f32.gmra.mxu0 %v339_v54  ;;  %653 = vmatpush.msra.mxu1 %v583_v5 }
  0x88   :  { %625 = vmatpush.msra.mxu0 %v549_v4  ;;  %686 = vmatpush.msra.mxu2 %v544_v6 }
  0x89   :  { %714 = vmatpush.msra.mxu3 %v578_v7  ;;  %465 = vmatmul.f32.gmra.mxu1 %v340_v59  ;;  %v405_v59 = vld [vmem:[%s1174_s7] sm:$0x3]  ;;  %s1042_s7 = smov [#allocation14]  }
  0x8a   :  { %626 = vmatpush.msra.mxu0 %v547_v8  ;;  %654 = vmatpush.msra.mxu1 %v581_v9  ;;  %v407_v60 = vperm.slane %v405_v59, 0  ;;  %v408_v61 = vperm.slane %v405_v59, 1  ;;  %s754_s9 = sshll.u32 %s1042_s7, 4  ;;  %s755_s9 = int_to_ptr.vmem [resolvable:$true] %s754_s9 }
  0x8b   :  { %687 = vmatmul.f32.vlgmr.msra.gmra.mxu2 %v535_v10  ;;  %715 = vmatpush.msra.mxu3 %v576_v11 }
  0x8c   :  { %627 = vmatpush.msra.mxu0 %v545_v12  ;;  %655 = vmatpush.msra.mxu1 %v579_v13 }
  0x8d   :  { %716 = vmatmul.f32.vlgmr.msra.gmra.mxu3 %v536_v14 }
  0x8e   :  { %628 = vmatpush.msra.mxu0 %v543_v15  ;;  %656 = vmatpush.msra.mxu1 %v577_v16 }
  0x8f   :  { %629 = vmatmul.f32.vlgmr.msra.gmra.mxu0 %v535_v10 }
  0x90   :  { %657 = vmatpush.msra.mxu1 %v575_v17 }
  0x91   :  { %658 = vmatmul.f32.vlgmr.msra.gmra.mxu1 %v536_v14 }
  0x93   :  { %690 = vmatmul.f32.gmra.mxu2 %v537_v18 }
  0x95   :  { %719 = vmatmul.f32.gmra.mxu3 %v538_v19 }
  0x97   :  { %632 = vmatmul.f32.gmra.mxu0 %v537_v18 }
  0x99   :  { %661 = vmatmul.f32.gmra.mxu1 %v538_v19 }
  0x9b   :  { %693 = vmatmul.f32.gmra.mxu2 %v539_v20 }
  0x9d   :  { %722 = vmatmul.f32.gmra.mxu3 %v540_v21 }
  0x9f   :  { %635 = vmatmul.f32.gmra.mxu0 %v539_v20 }
  0xa1   :  { %664 = vmatmul.f32.gmra.mxu1 %v540_v21 }
  0xa3   :  { %696 = vmatmul.f32.gmra.mxu2 %v541_v22 }
  0xa5   :  { %725 = vmatmul.f32.gmra.mxu3 %v542_v23 }
  0xa7   :  { %638 = vmatmul.f32.gmra.mxu0 %v541_v22 }
  0xa9   :  { %667 = vmatmul.f32.gmra.mxu1 %v542_v23 }
  0xbd   :  { %v226_v27 = vpop.f32.mrf.mxu0 }
  0xbe   :  { %v227_v28 = vadd.f32 %v226_v27, %v205_v25  ;;  %v607_v27 = vld [vmem:[%s1175_s8] sm:$0x3]  ;;  %s1043_s8 = smov [#allocation16]  }
  0xbf   :  { %v284_v29 = vpop.f32.mrf.mxu2  ;;  %s767_s10 = sshll.u32 %s1043_s8, 4  ;;  %s768_s10 = int_to_ptr.vmem [resolvable:$true] %s767_s10 }
  0xc0   :  { %v255_v30 = vpop.f32.mrf.mxu1  ;;  %v285_v31 = vadd.f32 %v284_v29, %v206_v26  ;;  %v313_v33 = vpop.f32.mrf.mxu3 }
  0xc1   :  { %v256_v32 = vadd.f32 %v255_v30, %v227_v28 }
  0xc2   :  { %v314_v34 = vadd.f32 %v313_v33, %v285_v31  ;;  %v609_v31 = vperm.slane %v607_v27, 0 }
  0xc3   :  { %325 = vst [vmem:[#allocation13] sm:$0xff] %v256_v32  ;;  %v610_v32 = vperm.slane %v607_v27, 1 }
  0xc4   :  { %326 = vst [vmem:[#allocation13 + $0x8] sm:$0xff] %v314_v34 }
  0xc7   :  { %v287_v36 = vpop.f32.mrf.mxu2 }
  0xc8   :  { %v229_v35 = vpop.f32.mrf.mxu0  ;;  %v288_v38 = vadd.f32 %v287_v36, %v206_v26 }
  0xc9   :  { %v230_v37 = vadd.f32 %v229_v35, %v205_v25 }
  0xca   :  { %v316_v39 = vpop.f32.mrf.mxu3  ;;  %v258_v40 = vpop.f32.mrf.mxu1 }
  0xcb   :  { %v317_v41 = vadd.f32 %v316_v39, %v288_v38  ;;  %v259_v42 = vadd.f32 %v258_v40, %v230_v37 }
  0xcd   :  { %328 = vst [vmem:[#allocation13 + $0x18] sm:$0xff] %v317_v41 }
  0xce   :  { %327 = vst [vmem:[#allocation13 + $0x10] sm:$0xff] %v259_v42 }
  0xd1   :  { %v290_v43 = vpop.f32.mrf.mxu2 }
  0xd2   :  { %v232_v44 = vpop.f32.mrf.mxu0  ;;  %v291_v45 = vadd.f32 %v290_v43, %v206_v26 }
  0xd3   :  { %v233_v46 = vadd.f32 %v232_v44, %v205_v25 }
  0xd4   :  { %v319_v47 = vpop.f32.mrf.mxu3  ;;  %v261_v48 = vpop.f32.mrf.mxu1 }
  0xd5   :  { %v320_v49 = vadd.f32 %v319_v47, %v291_v45  ;;  %v262_v50 = vadd.f32 %v261_v48, %v233_v46 }
  0xd7   :  { %330 = vst [vmem:[#allocation13 + $0x28] sm:$0xff] %v320_v49 }
  0xd8   :  { %329 = vst [vmem:[#allocation13 + $0x20] sm:$0xff] %v262_v50 }
  0xdb   :  { %v293_v51 = vpop.f32.mrf.mxu2 }
  0xdc   :  { %v235_v52 = vpop.f32.mrf.mxu0  ;;  %v294_v53 = vadd.f32 %v293_v51, %v206_v26 }
  0xdd   :  { %v236_v54 = vadd.f32 %v235_v52, %v205_v25 }
  0xde   :  { %v322_v55 = vpop.f32.mrf.mxu3  ;;  %v264_v56 = vpop.f32.mrf.mxu1 }
  0xdf   :  { %v323_v57 = vadd.f32 %v322_v55, %v294_v53  ;;  %v265_v58 = vadd.f32 %v264_v56, %v236_v54 }
  0xe1   :  { %332 = vst [vmem:[#allocation13 + $0x38] sm:$0xff] %v323_v57 }
  0xe2   :  { %331 = vst [vmem:[#allocation13 + $0x30] sm:$0xff] %v265_v58 }
  0xe3   :  { %749 = dma.vmem_to_hbm [thread:$0]  %s742_s28, 1024, %s744_s1, [#allocation4], %s1034_s25, %s1034_s25, %s1035_s26  }
  0xe6   :  { %v428_v62 = vpop.f32.mrf.mxu0  ;;  %v486_v63 = vpop.f32.mrf.mxu2 }
  0xe7   :  { %v429_v0 = vadd.f32 %v428_v62, %v407_v60  ;;  %v487_v1 = vadd.f32 %v486_v63, %v408_v61 }
  0xe8   :  { %v457_v2 = vpop.f32.mrf.mxu1  ;;  %v515_v3 = vpop.f32.mrf.mxu3 }
  0xe9   :  { %v458_v4 = vadd.f32 %v457_v2, %v429_v0  ;;  %v516_v5 = vadd.f32 %v515_v3, %v487_v1 }
  0xeb   :  { %527 = vst [vmem:[#allocation14] sm:$0xff] %v458_v4 }
  0xec   :  { %528 = vst [vmem:[#allocation14 + $0x8] sm:$0xff] %v516_v5 }
  0xef   :  { %v489_v6 = vpop.f32.mrf.mxu2 }
  0xf0   :  { %v431_v7 = vpop.f32.mrf.mxu0  ;;  %v490_v8 = vadd.f32 %v489_v6, %v408_v61 }
  0xf1   :  { %v432_v9 = vadd.f32 %v431_v7, %v407_v60 }
  0xf2   :  { %v518_v10 = vpop.f32.mrf.mxu3  ;;  %v460_v11 = vpop.f32.mrf.mxu1 }
  0xf3   :  { %v519_v12 = vadd.f32 %v518_v10, %v490_v8  ;;  %v461_v13 = vadd.f32 %v460_v11, %v432_v9 }
  0xf5   :  { %530 = vst [vmem:[#allocation14 + $0x18] sm:$0xff] %v519_v12 }
  0xf6   :  { %529 = vst [vmem:[#allocation14 + $0x10] sm:$0xff] %v461_v13 }
  0xf9   :  { %v492_v14 = vpop.f32.mrf.mxu2 }
  0xfa   :  { %v434_v15 = vpop.f32.mrf.mxu0  ;;  %v493_v16 = vadd.f32 %v492_v14, %v408_v61 }
  0xfb   :  { %v435_v17 = vadd.f32 %v434_v15, %v407_v60 }
  0xfc   :  { %v521_v18 = vpop.f32.mrf.mxu3  ;;  %v463_v19 = vpop.f32.mrf.mxu1 }
  0xfd   :  { %v522_v20 = vadd.f32 %v521_v18, %v493_v16  ;;  %v464_v21 = vadd.f32 %v463_v19, %v435_v17 }
  0xff   :  { %532 = vst [vmem:[#allocation14 + $0x28] sm:$0xff] %v522_v20 }
 0x100   :  { %531 = vst [vmem:[#allocation14 + $0x20] sm:$0xff] %v464_v21 }
 0x103   :  { %v495_v22 = vpop.f32.mrf.mxu2 }
 0x104   :  { %v437_v23 = vpop.f32.mrf.mxu0  ;;  %v496_v24 = vadd.f32 %v495_v22, %v408_v61 }
 0x105   :  { %v438_v25 = vadd.f32 %v437_v23, %v407_v60 }
 0x106   :  { %v524_v26 = vpop.f32.mrf.mxu3  ;;  %v466_v28 = vpop.f32.mrf.mxu1 }
 0x107   :  { %v525_v29 = vadd.f32 %v524_v26, %v496_v24  ;;  %v467_v30 = vadd.f32 %v466_v28, %v438_v25 }
 0x109   :  { %534 = vst [vmem:[#allocation14 + $0x38] sm:$0xff] %v525_v29 }
 0x10a   :  { %533 = vst [vmem:[#allocation14 + $0x30] sm:$0xff] %v467_v30 }
 0x10b   :  { %762 = dma.vmem_to_hbm [thread:$0]  %s755_s9, 1024, %s757_s15, [#allocation15], %s1034_s25, %s1034_s25, %s1035_s26  }
 0x10c   :  { %v630_v33 = vpop.f32.mrf.mxu0 }
 0x10d   :  { %v631_v34 = vadd.f32 %v630_v33, %v609_v31 }
 0x10e   :  { %v688_v35 = vpop.f32.mrf.mxu2  ;;  %v659_v37 = vpop.f32.mrf.mxu1 }
 0x10f   :  { %v689_v36 = vadd.f32 %v688_v35, %v610_v32  ;;  %v660_v38 = vadd.f32 %v659_v37, %v631_v34 }
 0x110   :  { %v717_v39 = vpop.f32.mrf.mxu3 }
 0x111   :  { %v718_v40 = vadd.f32 %v717_v39, %v689_v36  ;;  %729 = vst [vmem:[#allocation16] sm:$0xff] %v660_v38 }
 0x113   :  { %730 = vst [vmem:[#allocation16 + $0x8] sm:$0xff] %v718_v40 }
 0x114   :  { %v633_v41 = vpop.f32.mrf.mxu0 }
 0x115   :  { %v634_v42 = vadd.f32 %v633_v41, %v609_v31 }
 0x116   :  { %v691_v43 = vpop.f32.mrf.mxu2  ;;  %v662_v45 = vpop.f32.mrf.mxu1 }
 0x117   :  { %v692_v44 = vadd.f32 %v691_v43, %v610_v32  ;;  %v663_v46 = vadd.f32 %v662_v45, %v634_v42 }
 0x118   :  { %v720_v47 = vpop.f32.mrf.mxu3 }
 0x119   :  { %v721_v48 = vadd.f32 %v720_v47, %v692_v44  ;;  %731 = vst [vmem:[#allocation16 + $0x10] sm:$0xff] %v663_v46 }
 0x11b   :  { %732 = vst [vmem:[#allocation16 + $0x18] sm:$0xff] %v721_v48 }
 0x11c   :  { %v636_v49 = vpop.f32.mrf.mxu0 }
 0x11d   :  { %v637_v50 = vadd.f32 %v636_v49, %v609_v31 }
 0x11e   :  { %v694_v51 = vpop.f32.mrf.mxu2  ;;  %v665_v53 = vpop.f32.mrf.mxu1 }
 0x11f   :  { %v695_v52 = vadd.f32 %v694_v51, %v610_v32  ;;  %v666_v54 = vadd.f32 %v665_v53, %v637_v50 }
 0x120   :  { %v723_v55 = vpop.f32.mrf.mxu3 }
 0x121   :  { %v724_v56 = vadd.f32 %v723_v55, %v695_v52  ;;  %733 = vst [vmem:[#allocation16 + $0x20] sm:$0xff] %v666_v54 }
 0x123   :  { %734 = vst [vmem:[#allocation16 + $0x28] sm:$0xff] %v724_v56 }
 0x124   :  { %v639_v57 = vpop.f32.mrf.mxu0 }
 0x125   :  { %v640_v58 = vadd.f32 %v639_v57, %v609_v31 }
 0x126   :  { %v697_v59 = vpop.f32.mrf.mxu2  ;;  %v668_v61 = vpop.f32.mrf.mxu1 }
 0x127   :  { %v698_v60 = vadd.f32 %v697_v59, %v610_v32  ;;  %v669_v62 = vadd.f32 %v668_v61, %v640_v58 }
 0x128   :  { %v726_v63 = vpop.f32.mrf.mxu3 }
 0x129   :  { %v727_v0 = vadd.f32 %v726_v63, %v698_v60  ;;  %735 = vst [vmem:[#allocation16 + $0x30] sm:$0xff] %v669_v62 }
 0x12b   :  { %736 = vst [vmem:[#allocation16 + $0x38] sm:$0xff] %v727_v0 }
 0x12c   :  { %775 = dma.vmem_to_hbm [thread:$0]  %s768_s10, 1024, %s770_s19, [#allocation15], %s1034_s25, %s1034_s25, %s1035_s26  }
 0x12d   :  { %1029 = dma.done.wait [#allocation4], 1024  }
 0x12e   :  { %1030 = vsyncadd [#allocation4], 4294966272 }
 0x12f   :  { %1031 = dma.done.wait [#allocation15], 2048  }
 0x130   :  { %1032 = vsyncadd [#allocation15], 4294965248 }
 0x131   :  { %788 = vsyncpa [#allocation3], 1 }
 0x132   :  { %789 = vsyncpa [#allocation6], 1 }
 0x133   :  { %790 = vsyncpa [#allocation9], 1 }
 0x134   :  { %791 = vsyncpa [#allocation12], 1 }
 0x135   :  { %792 = vsyncpa [#allocation4], 1 }
 0x136   :  { %793 = vsyncpa [#allocation15], 1 }

</bundles_post_ra>
